<compile_context>
chip_gen: v5e
topology: v5e:2x2
jax: 0.10.0
libtpu: 0.0.40
codegen_flags: <defaults>
</compile_context>

<pallas_src>
import functools

import jax
import jax.numpy as jnp
from jax.experimental import pallas as pl
from jax.experimental.pallas import tpu as pltpu


def _round_up(n: int, m: int) -> int:
    return ((n + m - 1) // m) * m


def mlp_kernel(x_ref, w1_ref, b1_ref, w2_ref, b2_ref, o_ref):
    # Hidden layer: x @ W1 (MXU, fp32 accumulation) + b1, then ReLU (VPU).
    h = jnp.dot(x_ref[...], w1_ref[...], preferred_element_type=jnp.float32)
    h = jnp.maximum(h + b1_ref[...], 0.0)          # (TB, Hp) + (1, Hp) broadcast
    # Output layer: h @ W2 + b2.  N = n_output (unpadded) -> store is only
    # B*O*4 bytes of HBM writeback per call.
    y = jnp.dot(h, w2_ref[...], preferred_element_type=jnp.float32)
    o_ref[...] = (y + b2_ref[...]).astype(o_ref.dtype)


def make_net_params(w1, b1, w2, b2):
    """One-time (init-time) parameter preparation.

    w1: (F, H)  (already transposed vs. torch.nn.Linear.weight)
    b1: (H,)
    w2: (H, O)
    b2: (O,)

    Pads the *hidden* width H up to a multiple of 128 so the intermediate
    activation is lane-dense (exact: padded columns are zero).  The output
    width O is intentionally NOT padded (see header).
    """
    F, H = w1.shape
    O = w2.shape[1]
    Hp = _round_up(H, 128)
    w1p = jnp.zeros((F, Hp), w1.dtype).at[:, :H].set(w1)
    b1p = jnp.zeros((1, Hp), b1.dtype).at[0, :H].set(b1)
    w2p = jnp.zeros((Hp, O), w2.dtype).at[:H, :].set(w2)
    b2p = b2.reshape(1, O)
    return (w1p, b1p, w2p, b2p)


def net_forward(x, params, *, block_b: int = 2048, core_parallel: bool = False,
                vmem_limit_bytes: int | None = None):
    """Forward pass of Net.

    x:      (B, F) float32
    params: output of make_net_params()

    block_b:          batch tile (rows per grid step).  2048 keeps double-
                      buffered tiles a few MiB -- safe on v5e/v6e/v7x; raise
                      (and set vmem_limit_bytes) only for very large B.
    core_parallel:    set True on v7x to shard batch tiles across both
                      TensorCores (pltpu.CORE_PARALLEL).
    vmem_limit_bytes: optional scoped-VMEM override for very large block_b.
    """
    w1p, b1p, w2p, b2p = params
    B, F = x.shape
    Hp = w1p.shape[1]
    O = w2p.shape[1]
    out_dtype = x.dtype

    # Batch tile: multiple of 8 sublanes; no wrapper-side padding of x --
    # the ragged last block is masked on writeback by Pallas.
    TB = min(block_b, _round_up(B, 8))
    grid = (pl.cdiv(B, TB),)

    dim_sem = (pltpu.CORE_PARALLEL,) if core_parallel else ("parallel",)

    return pl.pallas_call(
        mlp_kernel,
        out_shape=jax.ShapeDtypeStruct((B, O), out_dtype),
        grid=grid,
        in_specs=[
            pl.BlockSpec((TB, F), lambda i: (i, 0)),    # x: tiled over batch
            pl.BlockSpec((F, Hp), lambda i: (0, 0)),    # w1: VMEM-resident
            pl.BlockSpec((1, Hp), lambda i: (0, 0)),    # b1: VMEM-resident
            pl.BlockSpec((Hp, O), lambda i: (0, 0)),    # w2: VMEM-resident
            pl.BlockSpec((1, O),  lambda i: (0, 0)),    # b2: VMEM-resident
        ],
        out_specs=pl.BlockSpec((TB, O), lambda i: (i, 0)),
        compiler_params=pltpu.CompilerParams(
            dimension_semantics=dim_sem,
            vmem_limit_bytes=vmem_limit_bytes),
    )(x, w1p, b1p, w2p, b2p)


if __name__ == "__main__":
    # Small shapes consistent with Net(n_features=32, n_hidden=64, n_output=16)
    B, n_features, n_hidden, n_output = 8, 32, 64, 16

    key = jax.random.PRNGKey(0)
    kx, kw1, kb1, kw2, kb2 = jax.random.split(key, 5)

    x = jax.random.normal(kx, (B, n_features), dtype=jnp.float32)
    # Deterministic init (mimics torch.nn.Linear uniform(-1/sqrt(fan_in), ...))
    lim1 = 1.0 / jnp.sqrt(jnp.float32(n_features))
    lim2 = 1.0 / jnp.sqrt(jnp.float32(n_hidden))
    w1 = jax.random.uniform(kw1, (n_features, n_hidden), jnp.float32, -lim1, lim1)
    b1 = jax.random.uniform(kb1, (n_hidden,), jnp.float32, -lim1, lim1)
    w2 = jax.random.uniform(kw2, (n_hidden, n_output), jnp.float32, -lim2, lim2)
    b2 = jax.random.uniform(kb2, (n_output,), jnp.float32, -lim2, lim2)

    # One-time parameter prep (hoisted out of the forward path).
    params = make_net_params(w1, b1, w2, b2)

    fwd = jax.jit(functools.partial(net_forward, block_b=2048))
    out = fwd(x, params)
    jax.block_until_ready(out)

    ref = jnp.maximum(x @ w1 + b1, 0.0) @ w2 + b2
    assert out.shape == (B, n_output)
    assert jnp.allclose(out, ref, atol=1e-5, rtol=1e-5)

    # Multi-step grid + ragged batch (partial last block, masked writeback).
    B2 = 20
    x2 = jax.random.normal(jax.random.PRNGKey(1), (B2, n_features), jnp.float32)
    out2 = net_forward(x2, params, block_b=8)
    jax.block_until_ready(out2)
    ref2 = jnp.maximum(x2 @ w1 + b1, 0.0) @ w2 + b2
    assert out2.shape == (B2, n_output)
    assert jnp.allclose(out2, ref2, atol=1e-5, rtol=1e-5)

    # Ragged batch smaller than one sublane group (single partial block).
    B3 = 5
    x3 = jax.random.normal(jax.random.PRNGKey(2), (B3, n_features), jnp.float32)
    out3 = net_forward(x3, params)
    jax.block_until_ready(out3)
    ref3 = jnp.maximum(x3 @ w1 + b1, 0.0) @ w2 + b2
    assert out3.shape == (B3, n_output)
    assert jnp.allclose(out3, ref3, atol=1e-5, rtol=1e-5)

    print("KERNEL_OK")
</pallas_src>

<mosaic_0001>
module attributes {stable_mosaic.version = 11 : i64} {
  func.func @mlp_kernel(%arg0: i32, %arg1: memref<8x32xf32, #tpu.memory_space<vmem>>, %arg2: memref<32x128xf32, #tpu.memory_space<vmem>>, %arg3: memref<1x128xf32, #tpu.memory_space<vmem>>, %arg4: memref<128x16xf32, #tpu.memory_space<vmem>>, %arg5: memref<1x16xf32, #tpu.memory_space<vmem>>, %arg6: memref<8x16xf32, #tpu.memory_space<vmem>>) attributes {dimension_semantics = [#tpu.dimension_semantics<parallel>], iteration_bounds = array<i64: 1>, scalar_prefetch = 0 : i64, scratch_operands = 0 : i64, tpu.core_type = #tpu.core_type<tc>, window_params = [{transform_indices = @transform_0, window_bounds = array<i64: 8, 32>}, {pipeline_mode = #tpu.pipeline_mode<synchronous>, transform_indices = @transform_1, window_bounds = array<i64: 32, 128>}, {pipeline_mode = #tpu.pipeline_mode<synchronous>, transform_indices = @transform_2, window_bounds = array<i64: 1, 128>}, {pipeline_mode = #tpu.pipeline_mode<synchronous>, transform_indices = @transform_3, window_bounds = array<i64: 128, 16>}, {pipeline_mode = #tpu.pipeline_mode<synchronous>, transform_indices = @transform_4, window_bounds = array<i64: 1, 16>}, {transform_indices = @transform_5, window_bounds = array<i64: 8, 16>}]} {
    %c0 = arith.constant 0 : index
    %c0_0 = arith.constant 0 : index
    %0 = vector.load %arg1[%c0, %c0_0] : memref<8x32xf32, #tpu.memory_space<vmem>>, vector<8x32xf32>
    %c0_1 = arith.constant 0 : index
    %c0_2 = arith.constant 0 : index
    %1 = vector.load %arg2[%c0_1, %c0_2] : memref<32x128xf32, #tpu.memory_space<vmem>>, vector<32x128xf32>
    %cst = arith.constant dense<0.000000e+00> : vector<8x128xf32>
    %2 = tpu.matmul %0, %1, %cst {dimension_numbers = #tpu.dot_dimension_numbers<[1], [0], [0], [1], [0, 0, 1, 1], [], []>} : vector<8x32xf32>, vector<32x128xf32>, vector<8x128xf32> -> vector<8x128xf32>
    %c0_3 = arith.constant 0 : index
    %c0_4 = arith.constant 0 : index
    %3 = vector.load %arg3[%c0_3, %c0_4] : memref<1x128xf32, #tpu.memory_space<vmem>>, vector<1x128xf32>
    %4 = vector.broadcast %3 : vector<1x128xf32> to vector<8x128xf32>
    %5 = arith.addf %2, %4 : vector<8x128xf32>
    %cst_5 = arith.constant 0.000000e+00 : f32
    %6 = vector.broadcast %cst_5 : f32 to vector<8x128xf32>
    %7 = arith.maximumf %5, %6 : vector<8x128xf32>
    %c0_6 = arith.constant 0 : index
    %c0_7 = arith.constant 0 : index
    %8 = vector.load %arg4[%c0_6, %c0_7] : memref<128x16xf32, #tpu.memory_space<vmem>>, vector<128x16xf32>
    %cst_8 = arith.constant dense<0.000000e+00> : vector<8x16xf32>
    %9 = tpu.matmul %7, %8, %cst_8 {dimension_numbers = #tpu.dot_dimension_numbers<[1], [0], [0], [1], [0, 0, 1, 1], [], []>} : vector<8x128xf32>, vector<128x16xf32>, vector<8x16xf32> -> vector<8x16xf32>
    %c0_9 = arith.constant 0 : index
    %c0_10 = arith.constant 0 : index
    %10 = vector.load %arg5[%c0_9, %c0_10] : memref<1x16xf32, #tpu.memory_space<vmem>>, vector<1x16xf32>
    %11 = vector.broadcast %10 : vector<1x16xf32> to vector<8x16xf32>
    %12 = arith.addf %9, %11 : vector<8x16xf32>
    %c0_11 = arith.constant 0 : index
    %c0_12 = arith.constant 0 : index
    %13 = vector.load %arg6[%c0_11, %c0_12] : memref<8x16xf32, #tpu.memory_space<vmem>>, vector<8x16xf32>
    tpu.vector_store %arg6[%c0_11, %c0_12], %12 {strides = array<i32>} : memref<8x16xf32, #tpu.memory_space<vmem>>, vector<8x16xf32>,
    return
  }
  func.func @transform_0(%arg0: i32) -> (i32, i32) {
    %c0_i32 = arith.constant 0 : i32
    %c0_i32_0 = arith.constant 0 : i32
    return %arg0, %c0_i32 : i32, i32
  }
  func.func @transform_1(%arg0: i32) -> (i32, i32) {
    %c0_i32 = arith.constant 0 : i32
    %c0_i32_0 = arith.constant 0 : i32
    %c0_i32_1 = arith.constant 0 : i32
    return %c0_i32, %c0_i32_0 : i32, i32
  }
  func.func @transform_2(%arg0: i32) -> (i32, i32) {
    %c0_i32 = arith.constant 0 : i32
    %c0_i32_0 = arith.constant 0 : i32
    %c0_i32_1 = arith.constant 0 : i32
    return %c0_i32, %c0_i32_0 : i32, i32
  }
  func.func @transform_3(%arg0: i32) -> (i32, i32) {
    %c0_i32 = arith.constant 0 : i32
    %c0_i32_0 = arith.constant 0 : i32
    %c0_i32_1 = arith.constant 0 : i32
    return %c0_i32, %c0_i32_0 : i32, i32
  }
  func.func @transform_4(%arg0: i32) -> (i32, i32) {
    %c0_i32 = arith.constant 0 : i32
    %c0_i32_0 = arith.constant 0 : i32
    %c0_i32_1 = arith.constant 0 : i32
    return %c0_i32, %c0_i32_0 : i32, i32
  }
  func.func @transform_5(%arg0: i32) -> (i32, i32) {
    %c0_i32 = arith.constant 0 : i32
    %c0_i32_0 = arith.constant 0 : i32
    return %arg0, %c0_i32 : i32, i32
  }
}

</mosaic_0001>

<bundles_post_ra>
// kernel: net_forward.1
= control target key start
LH: loop header
LB: loop body
LE: loop exit
PB: predicated region body
PF: predicated region fallthrough
CT: control target
= control target key end

     0   :  { %vm30_vm0 = vcmask 261120   ;;  %s246_s0 = inlined_call_operand.vmem [shape: f32[8,32], index: 0, kind: input, shape index: {}]   ;;  %s247_s1 = inlined_call_operand.vmem [shape: f32[32,128], index: 1, kind: input, shape index: {}]   ;;  %s248_s2 = inlined_call_operand.vmem [shape: f32[1,128], index: 2, kind: input, shape index: {}]   ;;  %s249_s3 = inlined_call_operand.vmem [shape: f32[128,16], index: 3, kind: input, shape index: {}]   ;;  %s250_s4 = inlined_call_operand.vmem [shape: f32[1,16], index: 4, kind: input, shape index: {}]   ;;  %s251_s5 = inlined_call_operand.hbm [shape: f32[8,16], index: 5, kind: output, shape index: {}]  }
   0x1   :  { %v25_v0 = vld [vmem:[%s247_s1 + $0x18] sm:$0xff]  ;;  %v24_v1 = vld [vmem:[%s247_s1 + $0x10] sm:$0xff]  ;;  %v23_v3 = vld [vmem:[%s247_s1 + $0x8] sm:$0xff] }
   0x2   :  { %46 = vmatpush.msra.mxu0 %v25_v0  ;;  %v70_v2 = vld [vmem:[%s249_s3 + $0x78] sm:$0xff]  ;;  %v69_v4 = vld [vmem:[%s249_s3 + $0x70] sm:$0xff]  ;;  %v68_v5 = vld [vmem:[%s249_s3 + $0x68] sm:$0xff] }
   0x3   :  { %75 = vmatpush.msra.mxu1 %v70_v2  ;;  %v22_v6 = vld [vmem:[%s247_s1] sm:$0xff]  ;;  %v66_v9 = vld [vmem:[%s249_s3 + $0x58] sm:$0xff] }
   0x4   :  { %47 = vmatpush.msra.mxu0 %v24_v1  ;;  %v21_v7 = vld [vmem:[%s246_s0] sm:$0xff] }
   0x5   :  { %76 = vmatpush.msra.mxu1 %v69_v4  ;;  %v67_v8 = vld [vmem:[%s249_s3 + $0x60] sm:$0xff] }
   0x6   :  { %48 = vmatpush.msra.mxu0 %v23_v3 }
   0x7   :  { %77 = vmatpush.msra.mxu1 %v68_v5 }
   0x8   :  { %49 = vmatpush.msra.mxu0 %v22_v6 }
   0x9   :  { %10 = vsyncpa [#allocation3], 0  ;;  %113 = vmatmul.msk.f32.vlgmr.msra.gmra.mxu0 %vm30_vm0, %v21_v7  ;;  %78 = vmatpush.msra.mxu1 %v67_v8  ;;  %v65_v10 = vld [vmem:[%s249_s3 + $0x50] sm:$0xff]  ;;  %v64_v11 = vld [vmem:[%s249_s3 + $0x48] sm:$0xff]  ;;  %s143_s12 = smov [#allocation2]   ;;  %s104_s14 = sshll.u32 %s251_s5, 4  ;;  %s105_s14 = int_to_ptr.hbm [resolvable:$true] %s104_s14 }
   0xa   :  { %v63_v12 = vld [vmem:[%s249_s3 + $0x40] sm:$0xff]  ;;  %v62_v13 = vld [vmem:[%s249_s3 + $0x38] sm:$0xff]  ;;  %v61_v14 = vld [vmem:[%s249_s3 + $0x30] sm:$0xff]  ;;  %s102_s1 = sshll.u32 %s143_s12, 4  ;;  %vm95_vm1 = vcmask 130048   ;;  %s103_s1 = int_to_ptr.vmem [resolvable:$true] %s102_s1 }
   0xb   :  { %79 = vmatpush.msra.mxu1 %v66_v9  ;;  %v60_v15 = vld [vmem:[%s249_s3 + $0x28] sm:$0xff]  ;;  %v59_v16 = vld [vmem:[%s249_s3 + $0x20] sm:$0xff]  ;;  %v58_v17 = vld [vmem:[%s249_s3 + $0x18] sm:$0xff] }
   0xc   :  { %v57_v18 = vld [vmem:[%s249_s3 + $0x10] sm:$0xff]  ;;  %v56_v19 = vld [vmem:[%s249_s3 + $0x8] sm:$0xff]  ;;  %v55_v20 = vld [vmem:[%s249_s3] sm:$0xff] }
   0xd   :  { %80 = vmatpush.msra.mxu1 %v65_v10  ;;  %v115_v21 = vld [vmem:[%s248_s2] ss:$0 sm:$0xff] }
   0xe   :  { %v116_v25 = vld [vmem:[%s250_s4] ss:$0 sm:$0xff] }
   0xf   :  { %81 = vmatpush.msra.mxu1 %v64_v11 }
  0x11   :  { %82 = vmatpush.msra.mxu1 %v63_v12 }
  0x13   :  { %83 = vmatpush.msra.mxu1 %v62_v13 }
  0x15   :  { %84 = vmatpush.msra.mxu1 %v61_v14 }
  0x17   :  { %85 = vmatpush.msra.mxu1 %v60_v15 }
  0x19   :  { %86 = vmatpush.msra.mxu1 %v59_v16 }
  0x1b   :  { %87 = vmatpush.msra.mxu1 %v58_v17 }
  0x1d   :  { %88 = vmatpush.msra.mxu1 %v57_v18 }
  0x1f   :  { %89 = vmatpush.msra.mxu1 %v56_v19 }
  0x21   :  { %90 = vmatpush.msra.mxu1 %v55_v20 }
  0x86   :  { %v51_v22 = vpop.f32.mrf.mxu0 }
  0x87   :  { %v52_v23 = vadd.f32 %v115_v21, %v51_v22 }
  0x89   :  { %v54_v24 = vmax.f32 %v52_v23, 0.0 }
  0x8b   :  { %91 = vmatmul.f32.vlgmr.msra.gmra.mxu1 %v54_v24 }
 0x108   :  { %v92_v26 = vpop.f32.mrf.mxu1 }
 0x109   :  { %v93_v27 = vadd.f32 %v116_v25, %v92_v26 }
 0x10b   :  { %96 = vst.msk [vmem:[#allocation2] sm:$0xff] %vm95_vm1, %v93_v27 }
 0x10c   :  { %107 = dma.vmem_to_hbm [thread:$0]  %s103_s1, 128, %s105_s14, [#allocation3]  }
 0x10d   :  { %141 = dma.done.wait [#allocation3], 128  }
 0x10e   :  { %142 = vsyncadd [#allocation3], 4294967168 }
 0x10f   :  { %112 = vsyncpa [#allocation3], 1 }

</bundles_post_ra>
